<compile_context>
chip_gen: v7x
topology: tpu7x:2x2x1
jax: 0.10.0
libtpu: 0.0.40
codegen_flags: <defaults>
</compile_context>

<pallas_src>
import functools

import jax
import jax.numpy as jnp
from jax.experimental import pallas as pl
from jax.experimental.pallas import tpu as pltpu

EPS = 1e-5


# ----------------------------- kernels ------------------------------------ #

def _ln_withbias_kernel(x_ref, w_ref, b_ref, o_ref, *, inv_c):
    x = x_ref[...]                                            # (C, T), in dtype
    xf = x.astype(jnp.float32)
    mu = jnp.sum(xf, axis=0, keepdims=True) * inv_c           # (1, T) f32
    xc = xf - mu
    var = jnp.sum(xc * xc, axis=0, keepdims=True) * inv_c     # unbiased=False
    inv = jax.lax.rsqrt(var + EPS)                            # EUP
    if o_ref.dtype == jnp.float32:
        w = w_ref[...].astype(jnp.float32)                    # (C, 1)
        b = b_ref[...].astype(jnp.float32)                    # (C, 1)
        o_ref[...] = (xc * inv * w + b).astype(o_ref.dtype)
    else:
        # Narrow epilogue (bf16 on v6e/v7x): stats stay f32, scale runs in
        # the storage dtype -> half the vreg pressure and store width.
        cd = o_ref.dtype
        o_ref[...] = ((x - mu.astype(cd)) * inv.astype(cd)
                      * w_ref[...].astype(cd) + b_ref[...].astype(cd))


def _ln_biasfree_kernel(x_ref, w_ref, o_ref, *, inv_c):
    x = x_ref[...]                                            # (C, T)
    xf = x.astype(jnp.float32)
    s1 = jnp.sum(xf, axis=0, keepdims=True)                   # (1, T)
    s2 = jnp.sum(xf * xf, axis=0, keepdims=True)              # (1, T)
    mu = s1 * inv_c
    var = jnp.maximum(s2 * inv_c - mu * mu, 0.0)              # E[x^2] - mu^2
    inv = jax.lax.rsqrt(var + EPS)
    # NOTE: BiasFree variant scales x (NOT x - mu), matching Restormer.
    if o_ref.dtype == jnp.float32:
        o_ref[...] = (xf * inv * w_ref[...].astype(jnp.float32)).astype(o_ref.dtype)
    else:
        cd = o_ref.dtype
        o_ref[...] = x * inv.astype(cd) * w_ref[...].astype(cd)


# ----------------------------- tiling helpers ------------------------------ #

def _choose_hw_tile(hw, c, itemsize, batch):
    """Pick a lane-dense spatial tile (multiple of 128, or full H*W).

    Dtype-aware byte budget (f32 temporaries dominate for narrow inputs) and
    megacore-aware: when tiling, try to keep batch * spatial_blocks >= 8 so a
    2-TC v7x part gets balanced work.
    """
    max_block_bytes = (2 << 20) if itemsize >= 4 else (1 << 20)
    target_lanes = max(128, max_block_bytes // max(1, c * itemsize))
    tile = max(128, (min(target_lanes, hw) // 128) * 128)
    if hw <= tile:
        return hw                  # full spatial extent: waives the 128 rule,
                                   # single block, no ragged tail at all.
    min_spatial_blocks = max(1, -(-8 // max(1, batch)))       # ceil(8 / batch)
    balanced_tile = max(128, (hw // min_spatial_blocks) // 128 * 128)
    return min(tile, balanced_tile)


def _vmem_limit_bytes(c, tile, in_itemsize):
    """Explicit scoped-VMEM budget: 2x double-buffered in + out blocks plus
    ~4 live f32 temporaries, with 1.5x headroom, capped for v7x (64 MiB)."""
    blk_in = c * tile * in_itemsize
    blk_f32 = c * tile * 4
    est = 4 * blk_in + 4 * blk_f32
    est = int(est * 1.5) + (2 << 20)
    return max(32 << 20, min(est, 48 << 20))


# ----------------------------- pallas_call wrapper ------------------------- #

def _ln_chw(x3, weight, bias, layernorm_type, tile):
    """x3: (B, C, HW).  Grid is (B, cdiv(HW, tile)); the last spatial block may
    be partial — Pallas masks its writeback, and per-pixel independence keeps
    the garbage tail columns harmless."""
    b, c, hw = x3.shape
    grid = (b, pl.cdiv(hw, tile))
    inv_c = 1.0 / c

    x_spec = pl.BlockSpec((pl.Squeezed(), c, tile), lambda i, j: (i, 0, j))
    p_spec = pl.BlockSpec((c, 1), lambda i, j: (0, 0))
    out_shape = jax.ShapeDtypeStruct((b, c, hw), x3.dtype)
    cp = pltpu.CompilerParams(
        dimension_semantics=("parallel", "parallel"),
        vmem_limit_bytes=_vmem_limit_bytes(c, tile, jnp.dtype(x3.dtype).itemsize),
    )

    w2 = weight.reshape(c, 1)
    if layernorm_type == "BiasFree":
        kernel = functools.partial(_ln_biasfree_kernel, inv_c=inv_c)
        in_specs = [x_spec, p_spec]
        args = (x3, w2)
    else:
        b2 = bias.reshape(c, 1)
        kernel = functools.partial(_ln_withbias_kernel, inv_c=inv_c)
        in_specs = [x_spec, p_spec, p_spec]
        args = (x3, w2, b2)

    return pl.pallas_call(
        kernel,
        out_shape=out_shape,
        grid_spec=pltpu.PrefetchScalarGridSpec(
            num_scalar_prefetch=0,
            grid=grid,
            in_specs=in_specs,
            out_specs=x_spec,
        ),
        compiler_params=cp,
    )(*args)


@functools.partial(jax.jit, static_argnames=("layernorm_type",))
def layernorm_nchw(x, weight, bias, layernorm_type="WithBias"):
    """Equivalent of LayerNorm(dim, LayerNorm_type).forward(x) for NCHW x."""
    b, c, h, w = x.shape
    hw = h * w
    x3 = x.reshape(b, c, hw)                      # free reshape, native layout
    tile = _choose_hw_tile(hw, c, jnp.dtype(x.dtype).itemsize, b)
    y3 = _ln_chw(x3, weight, bias, layernorm_type, tile)
    return y3.reshape(b, c, h, w)


# ----------------------------- pure-JAX reference -------------------------- #

def _reference(x, weight, bias, layernorm_type):
    b, c, h, w = x.shape
    x3 = jnp.transpose(x, (0, 2, 3, 1)).reshape(b, h * w, c).astype(jnp.float32)
    mu = jnp.mean(x3, axis=-1, keepdims=True)
    var = jnp.mean((x3 - mu) ** 2, axis=-1, keepdims=True)
    wf = weight.astype(jnp.float32)
    if layernorm_type == "BiasFree":
        y3 = x3 / jnp.sqrt(var + EPS) * wf
    else:
        y3 = (x3 - mu) / jnp.sqrt(var + EPS) * wf + bias.astype(jnp.float32)
    return jnp.transpose(y3.reshape(b, h, w, c), (0, 3, 1, 2)).astype(x.dtype)


# ----------------------------- self-test ----------------------------------- #

if __name__ == "__main__":
    key = jax.random.PRNGKey(0)
    ok = True

    # Case 1: module-init parameters (weight=ones, bias=zeros), H*W = 256.
    B, C, H, W = 2, 4, 16, 16
    k0, k1, k2, k3 = jax.random.split(key, 4)
    x = jax.random.normal(k0, (B, C, H, W), dtype=jnp.float32)
    weight = jnp.ones((C,), dtype=jnp.float32)
    bias = jnp.zeros((C,), dtype=jnp.float32)
    for ln_type in ("WithBias", "BiasFree"):
        out = jax.block_until_ready(
            layernorm_nchw(x, weight, bias, layernorm_type=ln_type))
        ref = _reference(x, weight, bias, ln_type)
        if out.shape != (B, C, H, W):
            ok = False
        if not jnp.allclose(out, ref, atol=1e-5, rtol=1e-5):
            ok = False

    # Case 2: non-trivial params + ragged spatial extent (H*W = 135 -> exercises
    # the partial boundary block with masked writeback, no pad/slice).
    B2, C2, H2, W2 = 1, 8, 9, 15
    x2 = jax.random.normal(k1, (B2, C2, H2, W2), dtype=jnp.float32)
    w2 = 1.0 + 0.1 * jax.random.normal(k2, (C2,), dtype=jnp.float32)
    b2 = 0.1 * jax.random.normal(k3, (C2,), dtype=jnp.float32)
    for ln_type in ("WithBias", "BiasFree"):
        out = jax.block_until_ready(
            layernorm_nchw(x2, w2, b2, layernorm_type=ln_type))
        ref = _reference(x2, w2, b2, ln_type)
        if out.shape != (B2, C2, H2, W2):
            ok = False
        if not jnp.allclose(out, ref, atol=1e-5, rtol=1e-5):
            ok = False

    # Case 3: bf16 input (exercises the narrow epilogue path); loose tolerance
    # because the epilogue runs in bf16 by design.
    xb = x.astype(jnp.bfloat16)
    for ln_type in ("WithBias", "BiasFree"):
        out = jax.block_until_ready(
            layernorm_nchw(xb, weight, bias, layernorm_type=ln_type))
        ref = _reference(xb, weight, bias, ln_type)
        if out.shape != (B, C, H, W):
            ok = False
        diff = jnp.max(jnp.abs(out.astype(jnp.float32) - ref.astype(jnp.float32)))
        if not bool(jnp.isfinite(diff)) or float(diff) > 0.2:
            ok = False

    if ok:
        print("KERNEL_OK")
    else:
        print("KERNEL_MISMATCH")
</pallas_src>

<mosaic_0001>
module attributes {stable_mosaic.version = 11 : i64} {
  func.func @_ln_withbias_kernel(%arg0: i32, %arg1: i32, %arg2: memref<1x4x256xf32, #tpu.memory_space<vmem>>, %arg3: memref<4x1xf32, #tpu.memory_space<vmem>>, %arg4: memref<4x1xf32, #tpu.memory_space<vmem>>, %arg5: memref<1x4x256xf32, #tpu.memory_space<vmem>>) attributes {dimension_semantics = [#tpu.dimension_semantics<parallel>, #tpu.dimension_semantics<parallel>], iteration_bounds = array<i64: 2, 1>, scalar_prefetch = 0 : i64, scratch_operands = 0 : i64, tpu.core_type = #tpu.core_type<tc>, window_params = [{transform_indices = @transform_0, window_bounds = array<i64: 1, 4, 256>}, {pipeline_mode = #tpu.pipeline_mode<synchronous>, transform_indices = @transform_1, window_bounds = array<i64: 4, 1>}, {pipeline_mode = #tpu.pipeline_mode<synchronous>, transform_indices = @transform_2, window_bounds = array<i64: 4, 1>}, {transform_indices = @transform_3, window_bounds = array<i64: 1, 4, 256>}]} {
    %c0 = arith.constant 0 : index
    %c0_0 = arith.constant 0 : index
    %c0_1 = arith.constant 0 : index
    %0 = vector.load %arg2[%c0, %c0_0, %c0_1] : memref<1x4x256xf32, #tpu.memory_space<vmem>>, vector<1x4x256xf32>
    %1 = vector.shape_cast %0 : vector<1x4x256xf32> to vector<4x256xf32>
    %cst = arith.constant dense<0.000000e+00> : vector<256xf32>
    %2 = vector.multi_reduction <add>, %1, %cst [0] : vector<4x256xf32> to vector<256xf32>
    %3 = vector.shape_cast %2 : vector<256xf32> to vector<1x256xf32>
    %cst_2 = arith.constant 2.500000e-01 : f32
    %4 = vector.broadcast %cst_2 : f32 to vector<1x256xf32>
    %5 = arith.mulf %3, %4 : vector<1x256xf32>
    %6 = vector.broadcast %5 : vector<1x256xf32> to vector<4x256xf32>
    %7 = arith.subf %1, %6 : vector<4x256xf32>
    %8 = arith.mulf %7, %7 : vector<4x256xf32>
    %cst_3 = arith.constant dense<0.000000e+00> : vector<256xf32>
    %9 = vector.multi_reduction <add>, %8, %cst_3 [0] : vector<4x256xf32> to vector<256xf32>
    %10 = vector.shape_cast %9 : vector<256xf32> to vector<1x256xf32>
    %cst_4 = arith.constant 2.500000e-01 : f32
    %11 = vector.broadcast %cst_4 : f32 to vector<1x256xf32>
    %12 = arith.mulf %10, %11 : vector<1x256xf32>
    %cst_5 = arith.constant 9.99999974E-6 : f32
    %13 = vector.broadcast %cst_5 : f32 to vector<1x256xf32>
    %14 = arith.addf %12, %13 : vector<1x256xf32>
    %15 = math.rsqrt %14 : vector<1x256xf32>
    %c0_6 = arith.constant 0 : index
    %c0_7 = arith.constant 0 : index
    %16 = vector.load %arg3[%c0_6, %c0_7] : memref<4x1xf32, #tpu.memory_space<vmem>>, vector<4x1xf32>
    %c0_8 = arith.constant 0 : index
    %c0_9 = arith.constant 0 : index
    %17 = vector.load %arg4[%c0_8, %c0_9] : memref<4x1xf32, #tpu.memory_space<vmem>>, vector<4x1xf32>
    %18 = vector.broadcast %15 : vector<1x256xf32> to vector<4x256xf32>
    %19 = arith.mulf %7, %18 : vector<4x256xf32>
    %20 = vector.broadcast %16 : vector<4x1xf32> to vector<4x256xf32>
    %21 = arith.mulf %19, %20 : vector<4x256xf32>
    %22 = vector.broadcast %17 : vector<4x1xf32> to vector<4x256xf32>
    %23 = arith.addf %21, %22 : vector<4x256xf32>
    %c0_10 = arith.constant 0 : index
    %c0_11 = arith.constant 0 : index
    %c0_12 = arith.constant 0 : index
    %24 = vector.load %arg5[%c0_10, %c0_11, %c0_12] : memref<1x4x256xf32, #tpu.memory_space<vmem>>, vector<1x4x256xf32>
    %25 = vector.shape_cast %24 : vector<1x4x256xf32> to vector<4x256xf32>
    %26 = vector.shape_cast %23 : vector<4x256xf32> to vector<1x4x256xf32>
    tpu.vector_store %arg5[%c0_10, %c0_11, %c0_12], %26 {strides = array<i32>} : memref<1x4x256xf32, #tpu.memory_space<vmem>>, vector<1x4x256xf32>,
    return
  }
  func.func @transform_0(%arg0: i32, %arg1: i32) -> (i32, i32, i32) {
    %c0_i32 = arith.constant 0 : i32
    %c0_i32_0 = arith.constant 0 : i32
    return %arg0, %c0_i32, %arg1 : i32, i32, i32
  }
  func.func @transform_1(%arg0: i32, %arg1: i32) -> (i32, i32) {
    %c0_i32 = arith.constant 0 : i32
    %c0_i32_0 = arith.constant 0 : i32
    %c0_i32_1 = arith.constant 0 : i32
    return %c0_i32, %c0_i32_0 : i32, i32
  }
  func.func @transform_2(%arg0: i32, %arg1: i32) -> (i32, i32) {
    %c0_i32 = arith.constant 0 : i32
    %c0_i32_0 = arith.constant 0 : i32
    %c0_i32_1 = arith.constant 0 : i32
    return %c0_i32, %c0_i32_0 : i32, i32
  }
  func.func @transform_3(%arg0: i32, %arg1: i32) -> (i32, i32, i32) {
    %c0_i32 = arith.constant 0 : i32
    %c0_i32_0 = arith.constant 0 : i32
    return %arg0, %c0_i32, %arg1 : i32, i32, i32
  }
}

</mosaic_0001>

<bundles_post_ra>
// kernel: layernorm_nchw.1
= control target key start
LH: loop header
LB: loop body
LE: loop exit
PB: predicated region body
PF: predicated region fallthrough
CT: control target
= control target key end

     0   :  { %s472_s12 = smov 0   ;;  %s474_s13 = smov 0   ;;  %s522_s0 = inlined_call_operand.vmem [shape: f32[2,4,256], index: 0, kind: input, shape index: {}]   ;;  %s523_s1 = inlined_call_operand.vmem [shape: f32[4,1], index: 1, kind: input, shape index: {}]   ;;  %s524_s2 = inlined_call_operand.vmem [shape: f32[4,1], index: 2, kind: input, shape index: {}]   ;;  %s525_s3 = inlined_call_operand.vmem [shape: f32[2,4,256], index: 3, kind: output, shape index: {}]  }
   0x1   :  { %s476_s14 = smov 0  }
   0x2 LB: > { %s25_s15 = sadd.s32 1, %s444_s13  ;;  %p385_p0 = scmp.ge.s32.totalorder %s448_s14, 1  ;;  %s448_s14 = sphi %s476_s14, %s13_s14   ;;  %s444_s13 = sphi %s474_s13, %s527_s13   ;;  %s440_s12 = sphi %s472_s12, %s526_s12  }
   0x3   : > { %p27_p1 = scmp.ge.s32.totalorder %s25_s15, 2  ;;  %p158_p2 = scmp.lt.s32.totalorder %s448_s14, 3 }
   0x5   : > { %s529_s15 = smov (%p27_p1, %s25_s15), 0  ;;  %p159_p3 = pnand %p385_p0, %p158_p2 }
   0x6   : > { %v260_v0 = vld [vmem:[%s523_s1] sm:$0xf] (!%p159_p3)  ;;  %v450_v1 = vmov (!%p159_p3), 0   ;;  %p191_p4 = scmp.lt.s32.totalorder (!%p159_p3), %s440_s12, 1  ;;  %vm214_vm0 = vcmask (!%p159_p3), 1043456   ;;  %v274_v45 = vlaneseq (!%p159_p3) }
   0x7   : > { %162 = sbr.rel (%p159_p3) target bundleno = 145 (0x91), region = 32  ;;  %420 = vset.pattern.permute.xlu0 (!%p159_p3), %v450_v1  ;;  %v261_v2 = vld [vmem:[%s524_s2] sm:$0xf] (!%p159_p3)  ;;  %v451_v43 = vmov (!%p159_p3), 839922192  }
   0x8   : > { %269 = vperm.xlu0 (!%p159_p3), %420, %v260_v0   ;;  %v272_v44 = vunpack.c.l.s4 (!%p159_p3), %v451_v43  ;;  %v275_v48 = vshrl.u32 (!%p159_p3), %v274_v45, 7 }
   0xa   : > { %v273_v47 = vunpack.c.0.s8 (!%p159_p3), %v272_v44 }
   0xc   : > { %282 = vperm.xlu0 (!%p159_p3), %420, %v261_v2   ;;  %v276_v50 = vsub.s32 (!%p159_p3), %v273_v47, %v275_v48 }
   0xe   : > { %s531_s12 = smov (!%p191_p4, %s440_s12), 1 }
   0xf   : > { %s392_s20 = sshll.u32 %s531_s12, 3 }
  0x10   : > { %s198_s23 = scalar_lea.vmem %s522_s0, %s392_s20  ;;  %s208_s26 = scalar_lea.vmem %s525_s3, %s392_s20 }
  0x11   : > { %v210_v3 = vld [vmem:[%s198_s23] sm:$0xff] }
  0x12   : > { %v212_v4 = vcombine.high %v210_v3, %v210_v3  ;;  %v215_v5 = vsel %vm214_vm0, %v210_v3, 0.0 }
  0x13   : > { %v216_v7 = vrot.slane %v215_v5, 4 }
  0x14   : > { %v222_v6 = vsel %vm214_vm0, %v212_v4, 0.0 }
  0x15   : > { %v223_v8 = vrot.slane %v222_v6, 4  ;;  %v217_v9 = vadd.f32 %v216_v7, %v215_v5 }
  0x17   : > { %v224_v10 = vadd.f32 %v223_v8, %v222_v6  ;;  %v218_v11 = vrot.slane %v217_v9, 2 }
  0x19   : > { %v225_v12 = vrot.slane %v224_v10, 2  ;;  %v219_v13 = vadd.f32 %v218_v11, %v217_v9 }
  0x1b   : > { %v226_v14 = vadd.f32 %v225_v12, %v224_v10  ;;  %v220_v15 = vrot.slane %v219_v13, 1 }
  0x1d   : > { %v227_v16 = vrot.slane %v226_v14, 1  ;;  %v221_v17 = vadd.f32 %v220_v15, %v219_v13 }
  0x1f   : > { %v228_v18 = vadd.f32 %v227_v16, %v226_v14  ;;  %v229_v19 = vmul.f32 0.25, %v221_v17 }
  0x21   : > { %v230_v20 = vmul.f32 0.25, %v228_v18 }
  0x23   : > { %v233_v21 = vcombine.low %v229_v19, %v230_v20 }
  0x25   : > { %v235_v22 = vsub.f32 %v210_v3, %v233_v21 }
  0x27   : > { %v236_v23 = vmul.f32 %v235_v22, %v235_v22 }
  0x29   : > { %v238_v24 = vcombine.high %v236_v23, %v236_v23  ;;  %v240_v25 = vsel %vm214_vm0, %v236_v23, 0.0 }
  0x2a   : > { %v241_v27 = vrot.slane %v240_v25, 4 }
  0x2b   : > { %v247_v26 = vsel %vm214_vm0, %v238_v24, 0.0 }
  0x2c   : > { %v248_v28 = vrot.slane %v247_v26, 4  ;;  %v242_v29 = vadd.f32 %v241_v27, %v240_v25 }
  0x2e   : > { %v249_v30 = vadd.f32 %v248_v28, %v247_v26  ;;  %v243_v31 = vrot.slane %v242_v29, 2 }
  0x30   : > { %v250_v32 = vrot.slane %v249_v30, 2  ;;  %v244_v33 = vadd.f32 %v243_v31, %v242_v29 }
  0x32   : > { %v251_v34 = vadd.f32 %v250_v32, %v249_v30  ;;  %v245_v35 = vrot.slane %v244_v33, 1 }
  0x34   : > { %v252_v36 = vrot.slane %v251_v34, 1  ;;  %v246_v37 = vadd.f32 %v245_v35, %v244_v33 }
  0x36   : > { %v253_v38 = vadd.f32 %v252_v36, %v251_v34  ;;  %v254_v39 = vmul.f32 0.25, %v246_v37 }
  0x38   : > { %v255_v40 = vmul.f32 0.25, %v253_v38  ;;  %v256_v41 = vadd.f32 1e-05, %v254_v39 }
  0x3a   : > { %v257_v42 = vadd.f32 1e-05, %v255_v40  ;;  %422 = vrsqrt.f32 %v256_v41 }
  0x3c   : > { %424 = vrsqrt.f32 %v257_v42 }
  0x44   : > { %v423_v46 = vpop.eup %422 }
  0x46   : > { %v425_v49 = vpop.eup %424 }
  0x47   : > { %v264_v51 = vcombine.low %v423_v46, %v425_v49 }
  0x49   : > { %v266_v53 = vmul.f32 %v264_v51, %v235_v22 }
  0x87   : > { %v270_v52 = vpop.permute.xlu0 %269 }
  0x88   : > { %v277_v54 = vrot.slane %v270_v52, %v276_v50 }
  0x8a   : > { %v279_v56 = vmul.f32 %v277_v54, %v266_v53 }
  0x8b   : > { %v283_v55 = vpop.permute.xlu0 %282 }
  0x8c   : > { %v290_v57 = vrot.slane %v283_v55, %v276_v50 }
  0x8e   : > { %v292_v58 = vadd.f32 %v290_v57, %v279_v56 }
  0x90   : > { %293 = vst [vmem:[%s208_s26] sm:$0xff] %v292_v58 }
  0x91 PF: > { %s13_s14 = sadd.s32 1, %s448_s14   ;;  %s526_s12 = smov %s444_s13 }
  0x92   : > { %p10_p5 = scmp.ge.s32.totalorder %s13_s14, 4   ;;  %s527_s13 = smov %s529_s15 }
  0x94   :  { %12 = sbr.rel (!%p10_p5) target bundleno = 2 (0x2), region = 62 }

</bundles_post_ra>
